<compile_context>
chip_gen: v7x
topology: tpu7x:2x2x1
jax: 0.10.0
libtpu: 0.0.40
codegen_flags: <defaults>
</compile_context>

<pallas_src>
import math
import functools

import jax
import jax.numpy as jnp
from jax import lax
from jax.experimental import pallas as pl
from jax.experimental.pallas import tpu as pltpu

NEG_INF = -1.0e30


def _round_up(a, b):
    return -(-a // b) * b


# ----------------------------------------------------------------------------
# Pallas kernel: fused LayerNorm + vocab projection + log_softmax
# ----------------------------------------------------------------------------
def _ln_proj_logsoftmax_kernel(x_ref, g_ref, b_ref, w_ref, bias_ref, logp_ref,
                               *, h_true, h_pad):
    # x_ref:(TM,H_pad) any-dtype   g_ref/b_ref:(1,H_pad) f32
    # w_ref:(H_pad,Vp) bf16        bias_ref:(1,Vp) f32      logp_ref:(TM,Vp) f32
    x = x_ref[...].astype(jnp.float32)                     # (TM, H_pad)
    inv_h = 1.0 / float(h_true)

    # LayerNorm (PyTorch default eps=1e-5), centered variance (numerically safer).
    mean = jnp.sum(x, axis=-1, keepdims=True) * inv_h
    xc = x - mean
    if h_pad != h_true:
        # Padded K columns hold zeros in x; exclude them from centered stats.
        col = lax.broadcasted_iota(jnp.int32, (1, h_pad), 1)
        xc = jnp.where(col < h_true, xc, 0.0)
    var = jnp.sum(xc * xc, axis=-1, keepdims=True) * inv_h
    xn = xc * lax.rsqrt(var + 1e-5)
    xn = xn * g_ref[...] + b_ref[...]                      # broadcast (1,H_pad)

    # tgt_word_prj: bf16 operands on the MXU, f32 accumulation.
    logits = jnp.dot(xn.astype(jnp.bfloat16), w_ref[...],
                     preferred_element_type=jnp.float32) + bias_ref[...]

    # log_softmax over the (padded) vocab. Padded columns carry bias = -1e30, so they
    # contribute 0 to the sum-exp and do not perturb the real columns.
    m = jnp.max(logits, axis=-1, keepdims=True)
    shifted = logits - m                                   # reused: logits dies here
    l = jnp.sum(jnp.exp(shifted), axis=-1, keepdims=True)
    logp_ref[...] = shifted - jnp.log(l)


def layernorm_project_logsoftmax(x, ln_gamma, ln_beta, w, bias, *, tm=None):
    """x: (N, Ti, H); w: (H, V); returns log_probs (N, Ti, V_pad) f32 (vocab padded
    to a multiple of 128; padded columns are ~ -1e30 and never used downstream)."""
    N, Ti, H = x.shape
    V = w.shape[1]
    rows = N * Ti
    x_bytes = jnp.dtype(x.dtype).itemsize

    # Lane-dense vocab: pad V up to a multiple of 128.
    V_pad = _round_up(V, 128)
    # Optional K padding (MXU contraction fill) only for large, misaligned H.
    H_pad = H if (H <= 128 or H % 128 == 0) else _round_up(H, 128)

    # ---- generation-aware VMEM capacity & row-tile selection -------------------
    try:
        vmem_cap = int(pltpu.get_tpu_info().vmem_capacity_bytes)
    except Exception:
        vmem_cap = 64 << 20                                     # conservative fallback
    tm_cap = 128 if vmem_cap <= (64 << 20) else 256             # v7x vs v5e/v6e
    if tm is not None:
        tm_cap = int(tm)

    # Keep the grid a few steps deep (DMA/compute overlap + megacore / 2-TC sharding).
    desired_steps = max(2, min(8, rows // 8)) if rows >= 16 else 1
    TM = min(tm_cap, max(8, _round_up(pl.cdiv(rows, desired_steps), 8)))
    # Prefer a TM that divides rows exactly (no padded rows -> no post-kernel row slice).
    for cand in range(TM, 7, -8):
        if rows % cand == 0:
            TM = cand
            break

    # VMEM estimate: double-buffered x / out blocks + single-buffered resident weight
    # + in-kernel full-size temporaries (shifted logits, exp(), x f32, xn f32, xn bf16).
    def _est(tm_):
        return (2 * tm_ * H_pad * x_bytes       # x blocks
                + 2 * tm_ * V_pad * 4           # log_prob out blocks
                + H_pad * V_pad * 2             # resident bf16 weight (single copy)
                + V_pad * 4 + 2 * H_pad * 4     # bias, gamma, beta (resident)
                + 2 * tm_ * V_pad * 4           # temps: shifted + exp
                + tm_ * H_pad * 10)             # temps: x f32, xn f32, xn bf16

    while TM > 8 and _est(TM) > int(0.85 * vmem_cap):
        TM = max(8, _round_up(TM // 2, 8))
    rows_pad = _round_up(rows, TM)
    vmem_limit = min(max(int(1.25 * _est(TM)) + (4 << 20), 32 << 20),
                     int(0.9 * vmem_cap))

    # ---- operand preparation ----------------------------------------------------
    x2 = x.reshape(rows, H)                                   # native dtype; kernel upcasts
    if rows_pad != rows or H_pad != H:
        x2 = jnp.pad(x2, ((0, rows_pad - rows), (0, H_pad - H)))

    w_bf16 = w.astype(jnp.bfloat16)
    bias_f32 = bias.astype(jnp.float32)
    gamma = ln_gamma.astype(jnp.float32)
    beta = ln_beta.astype(jnp.float32)
    if V_pad != V:
        w_bf16 = jnp.pad(w_bf16, ((0, 0), (0, V_pad - V)))
        bias_f32 = jnp.pad(bias_f32, (0, V_pad - V), constant_values=NEG_INF)
    if H_pad != H:
        w_bf16 = jnp.pad(w_bf16, ((0, H_pad - H), (0, 0)))
        gamma = jnp.pad(gamma, (0, H_pad - H))
        beta = jnp.pad(beta, (0, H_pad - H))

    kernel = functools.partial(_ln_proj_logsoftmax_kernel, h_true=H, h_pad=H_pad)

    # Resident (constant-across-grid) operands go in as whole arrays pinned in VMEM
    # (single-buffered, outside the revolving pipeline).
    resident = pl.BlockSpec(memory_space=pltpu.MemorySpace.VMEM)

    grid_spec = pltpu.PrefetchScalarGridSpec(
        num_scalar_prefetch=0,
        grid=(rows_pad // TM,),
        in_specs=[
            pl.BlockSpec((TM, H_pad), lambda i: (i, 0)),      # x: row-tiled, pipelined
            resident,                                         # gamma
            resident,                                         # beta
            resident,                                         # weight (bf16)
            resident,                                         # bias
        ],
        out_specs=pl.BlockSpec((TM, V_pad), lambda i: (i, 0)),
    )

    logp = pl.pallas_call(
        kernel,
        out_shape=jax.ShapeDtypeStruct((rows_pad, V_pad), jnp.float32),
        grid_spec=grid_spec,
        compiler_params=pltpu.CompilerParams(
            dimension_semantics=("parallel",),
            vmem_limit_bytes=vmem_limit,
        ),
    )(x2, gamma.reshape(1, H_pad), beta.reshape(1, H_pad),
      w_bf16, bias_f32.reshape(1, V_pad))

    if rows_pad != rows:              # only if TM could not divide rows exactly
        logp = logp[:rows]
    return logp.reshape(N, Ti, V_pad)


# ----------------------------------------------------------------------------
# preprocess(): strip IGNORE_ID, append <eos>, pad with IGNORE_ID  (plain-JAX glue)
# ----------------------------------------------------------------------------
def preprocess(padded_input, ignore_id, eos_id):
    N, To = padded_input.shape
    lengths = jnp.sum(padded_input != ignore_id, axis=1)          # valid tokens per row
    ys_out = jnp.full((N, To + 1), ignore_id, dtype=padded_input.dtype)
    ys_out = ys_out.at[:, :To].set(padded_input)
    ys_out = ys_out.at[jnp.arange(N), lengths].set(eos_id)        # append eos
    return ys_out, lengths + 1                                    # target lengths incl. eos


# ----------------------------------------------------------------------------
# CTC loss matching torch.nn.CTCLoss(blank=0, reduction='none', zero_infinity=True).
# Alpha DP over time in log-space; plain-JAX scan (glue, not the matmul hot path).
# The needed vocab columns are pre-gathered once, so the sequential DP streams only
# (T, 2L+1) values instead of (T, V_pad).
# ----------------------------------------------------------------------------
def ctc_loss_single(log_probs, targets, target_len, blank=0):
    T, _ = log_probs.shape
    L = targets.shape[0]
    S = 2 * L + 1
    ext = jnp.zeros((S,), jnp.int32).at[1::2].set(targets.astype(jnp.int32))
    ext = ext.at[0::2].set(blank)
    idx = jnp.arange(S)
    s_len = 2 * target_len + 1
    valid = idx < s_len

    lp_ext = log_probs[:, ext]                                    # (T, S) — one gather

    alpha0 = jnp.full((S,), NEG_INF)
    alpha0 = alpha0.at[0].set(lp_ext[0, 0])
    alpha0 = alpha0.at[1].set(lp_ext[0, 1])
    alpha0 = jnp.where(valid, alpha0, NEG_INF)

    prev_lab = jnp.concatenate([jnp.full((2,), -1, jnp.int32), ext[:-2]])
    no_skip = (idx % 2 == 0) | (ext == prev_lab)

    def step(alpha, lp):
        a1 = jnp.concatenate([jnp.full((1,), NEG_INF), alpha[:-1]])
        a2 = jnp.concatenate([jnp.full((2,), NEG_INF), alpha[:-2]])
        a2 = jnp.where(no_skip, NEG_INF, a2)
        new = jnp.logaddexp(jnp.logaddexp(alpha, a1), a2) + lp
        new = jnp.where(valid, new, NEG_INF)
        return new, None

    alpha, _ = lax.scan(step, alpha0, lp_ext[1:])
    ll = jnp.logaddexp(alpha[s_len - 1], alpha[s_len - 2])
    loss = -ll
    # zero_infinity=True: impossible alignments (and NaN) are zeroed (matches torch).
    loss = jnp.where(jnp.isfinite(loss) & (loss < 1e29), loss, 0.0)
    return loss


# ----------------------------------------------------------------------------
# Decoder.forward
# ----------------------------------------------------------------------------
def decoder_forward(params, padded_input, encoder_padded_outputs, ignore_id, eos_id):
    ys_out_pad, target_lens = preprocess(padded_input, ignore_id, eos_id)

    V = params["prj_b"].shape[0]
    # (N, Ti, V_pad): fed directly to the CTC DP (its gather never touches pad columns),
    # avoiding a full-tensor slice copy on the loss path.
    log_probs_padded = layernorm_project_logsoftmax(
        encoder_padded_outputs,
        params["ln_gamma"], params["ln_beta"],
        params["prj_w"], params["prj_b"],
    )

    losses = jax.vmap(ctc_loss_single)(log_probs_padded, ys_out_pad, target_lens)
    norm_factor = jnp.sum(target_lens)                            # gold_concatenated.shape[0]
    cost = jnp.sum(losses) / norm_factor.astype(jnp.float32)

    # User-facing log_probs without the vocab padding (not on the loss path).
    log_probs = log_probs_padded[..., :V]

    # TODO(synk): Char_cer / Word_cer need SentencePiece decoding + editdistance on
    # python strings — no Pallas/JAX equivalent, left as None.
    return {
        "cost": cost,
        "dec_slf_attn_list": [],
        "dec_enc_attn_list": [],
        "Char_cer": None,
        "Word_cer": None,
        "log_probs": log_probs,
    }


if __name__ == "__main__":
    key = jax.random.PRNGKey(0)
    k_enc, k_tgt, k_w, k_b = jax.random.split(key, 4)

    # small shapes consistent with the module
    N, Ti, H = 2, 16, 32                 # batch, encoder frames, d_model
    targets_no = 12
    V = targets_no + 4                   # Wout_size
    ignore_id = targets_no               # pad_index / IGNORE_ID
    eos_id = targets_no + 2
    To = 8                               # max target length

    # deterministic parameters (LayerNorm defaults; Linear uniform +-1/sqrt(H))
    bound = 1.0 / math.sqrt(H)
    params = {
        "ln_gamma": jnp.ones((H,), jnp.float32),
        "ln_beta": jnp.zeros((H,), jnp.float32),
        "prj_w": jax.random.uniform(k_w, (H, V), jnp.float32, -bound, bound),
        "prj_b": jax.random.uniform(k_b, (V,), jnp.float32, -bound, bound),
    }

    # inputs
    encoder_padded_outputs = jax.random.normal(k_enc, (N, Ti, H), jnp.float32)
    raw_tgt = jax.random.randint(k_tgt, (N, To), 1, targets_no)
    tgt_lens = jnp.array([6, 8], jnp.int32)
    pad_mask = jnp.arange(To)[None, :] < tgt_lens[:, None]
    padded_input = jnp.where(pad_mask, raw_tgt, ignore_id).astype(jnp.int32)

    out = decoder_forward(params, padded_input, encoder_padded_outputs, ignore_id, eos_id)
    jax.block_until_ready(out["cost"])
    jax.block_until_ready(out["log_probs"])
    print("KERNEL_OK")
</pallas_src>

<mosaic_0001>
module attributes {stable_mosaic.version = 11 : i64} {
  func.func @_ln_proj_logsoftmax_kernel(%arg0: i32, %arg1: memref<8x32xf32, #tpu.memory_space<vmem>>, %arg2: memref<1x32xf32, #tpu.memory_space<vmem>>, %arg3: memref<1x32xf32, #tpu.memory_space<vmem>>, %arg4: memref<32x128xbf16, #tpu.memory_space<vmem>>, %arg5: memref<1x128xf32, #tpu.memory_space<vmem>>, %arg6: memref<8x128xf32, #tpu.memory_space<vmem>>) attributes {dimension_semantics = [#tpu.dimension_semantics<parallel>], iteration_bounds = array<i64: 4>, scalar_prefetch = 0 : i64, scratch_operands = 0 : i64, tpu.core_type = #tpu.core_type<tc>, window_params = [{transform_indices = @transform_0, window_bounds = array<i64: 8, 32>}, {pipeline_mode = #tpu.pipeline_mode<synchronous>, transform_indices = @transform_1, window_bounds = array<i64: 1, 32>}, {pipeline_mode = #tpu.pipeline_mode<synchronous>, transform_indices = @transform_2, window_bounds = array<i64: 1, 32>}, {pipeline_mode = #tpu.pipeline_mode<synchronous>, transform_indices = @transform_3, window_bounds = array<i64: 32, 128>}, {pipeline_mode = #tpu.pipeline_mode<synchronous>, transform_indices = @transform_4, window_bounds = array<i64: 1, 128>}, {transform_indices = @transform_5, window_bounds = array<i64: 8, 128>}]} {
    %c0 = arith.constant 0 : index
    %c0_0 = arith.constant 0 : index
    %0 = vector.load %arg1[%c0, %c0_0] : memref<8x32xf32, #tpu.memory_space<vmem>>, vector<8x32xf32>
    %cst = arith.constant dense<0.000000e+00> : vector<8xf32>
    %1 = vector.multi_reduction <add>, %0, %cst [1] : vector<8x32xf32> to vector<8xf32>
    %2 = vector.shape_cast %1 : vector<8xf32> to vector<8x1xf32>
    %cst_1 = arith.constant 3.125000e-02 : f32
    %3 = vector.broadcast %cst_1 : f32 to vector<8x1xf32>
    %4 = arith.mulf %2, %3 : vector<8x1xf32>
    %5 = vector.broadcast %4 : vector<8x1xf32> to vector<8x32xf32>
    %6 = arith.subf %0, %5 : vector<8x32xf32>
    %7 = arith.mulf %6, %6 : vector<8x32xf32>
    %cst_2 = arith.constant dense<0.000000e+00> : vector<8xf32>
    %8 = vector.multi_reduction <add>, %7, %cst_2 [1] : vector<8x32xf32> to vector<8xf32>
    %9 = vector.shape_cast %8 : vector<8xf32> to vector<8x1xf32>
    %cst_3 = arith.constant 3.125000e-02 : f32
    %10 = vector.broadcast %cst_3 : f32 to vector<8x1xf32>
    %11 = arith.mulf %9, %10 : vector<8x1xf32>
    %cst_4 = arith.constant 9.99999974E-6 : f32
    %12 = vector.broadcast %cst_4 : f32 to vector<8x1xf32>
    %13 = arith.addf %11, %12 : vector<8x1xf32>
    %14 = math.rsqrt %13 : vector<8x1xf32>
    %15 = vector.broadcast %14 : vector<8x1xf32> to vector<8x32xf32>
    %16 = arith.mulf %6, %15 : vector<8x32xf32>
    %c0_5 = arith.constant 0 : index
    %c0_6 = arith.constant 0 : index
    %17 = vector.load %arg2[%c0_5, %c0_6] : memref<1x32xf32, #tpu.memory_space<vmem>>, vector<1x32xf32>
    %18 = vector.broadcast %17 : vector<1x32xf32> to vector<8x32xf32>
    %19 = arith.mulf %16, %18 : vector<8x32xf32>
    %c0_7 = arith.constant 0 : index
    %c0_8 = arith.constant 0 : index
    %20 = vector.load %arg3[%c0_7, %c0_8] : memref<1x32xf32, #tpu.memory_space<vmem>>, vector<1x32xf32>
    %21 = vector.broadcast %20 : vector<1x32xf32> to vector<8x32xf32>
    %22 = arith.addf %19, %21 : vector<8x32xf32>
    %23 = arith.truncf %22 : vector<8x32xf32> to vector<8x32xbf16>
    %c0_9 = arith.constant 0 : index
    %c0_10 = arith.constant 0 : index
    %24 = vector.load %arg4[%c0_9, %c0_10] : memref<32x128xbf16, #tpu.memory_space<vmem>>, vector<32x128xbf16>
    %cst_11 = arith.constant dense<0.000000e+00> : vector<8x128xf32>
    %25 = tpu.matmul %23, %24, %cst_11 {dimension_numbers = #tpu.dot_dimension_numbers<[1], [0], [0], [1], [0, 0, 1, 1], [], []>} : vector<8x32xbf16>, vector<32x128xbf16>, vector<8x128xf32> -> vector<8x128xf32>
    %c0_12 = arith.constant 0 : index
    %c0_13 = arith.constant 0 : index
    %26 = vector.load %arg5[%c0_12, %c0_13] : memref<1x128xf32, #tpu.memory_space<vmem>>, vector<1x128xf32>
    %27 = vector.broadcast %26 : vector<1x128xf32> to vector<8x128xf32>
    %28 = arith.addf %25, %27 : vector<8x128xf32>
    %cst_14 = arith.constant dense<0xFF800000> : vector<8xf32>
    %29 = vector.multi_reduction <maximumf>, %28, %cst_14 [1] : vector<8x128xf32> to vector<8xf32>
    %30 = vector.shape_cast %29 : vector<8xf32> to vector<8x1xf32>
    %31 = vector.broadcast %30 : vector<8x1xf32> to vector<8x128xf32>
    %32 = arith.subf %28, %31 : vector<8x128xf32>
    %33 = math.exp %32 : vector<8x128xf32>
    %cst_15 = arith.constant dense<0.000000e+00> : vector<8xf32>
    %34 = vector.multi_reduction <add>, %33, %cst_15 [1] : vector<8x128xf32> to vector<8xf32>
    %35 = vector.shape_cast %34 : vector<8xf32> to vector<8x1xf32>
    %36 = math.log %35 : vector<8x1xf32>
    %37 = vector.broadcast %36 : vector<8x1xf32> to vector<8x128xf32>
    %38 = arith.subf %32, %37 : vector<8x128xf32>
    %c0_16 = arith.constant 0 : index
    %c0_17 = arith.constant 0 : index
    %39 = vector.load %arg6[%c0_16, %c0_17] : memref<8x128xf32, #tpu.memory_space<vmem>>, vector<8x128xf32>
    tpu.vector_store %arg6[%c0_16, %c0_17], %38 {strides = array<i32>} : memref<8x128xf32, #tpu.memory_space<vmem>>, vector<8x128xf32>,
    return
  }
  func.func @transform_0(%arg0: i32) -> (i32, i32) {
    %c0_i32 = arith.constant 0 : i32
    %c0_i32_0 = arith.constant 0 : i32
    return %arg0, %c0_i32 : i32, i32
  }
  func.func @transform_1(%arg0: i32) -> (i32, i32) {
    %c0_i32 = arith.constant 0 : i32
    %c0_i32_0 = arith.constant 0 : i32
    %c0_i32_1 = arith.constant 0 : i32
    return %c0_i32, %c0_i32_0 : i32, i32
  }
  func.func @transform_2(%arg0: i32) -> (i32, i32) {
    %c0_i32 = arith.constant 0 : i32
    %c0_i32_0 = arith.constant 0 : i32
    %c0_i32_1 = arith.constant 0 : i32
    return %c0_i32, %c0_i32_0 : i32, i32
  }
  func.func @transform_3(%arg0: i32) -> (i32, i32) {
    %c0_i32 = arith.constant 0 : i32
    %c0_i32_0 = arith.constant 0 : i32
    %c0_i32_1 = arith.constant 0 : i32
    return %c0_i32, %c0_i32_0 : i32, i32
  }
  func.func @transform_4(%arg0: i32) -> (i32, i32) {
    %c0_i32 = arith.constant 0 : i32
    %c0_i32_0 = arith.constant 0 : i32
    %c0_i32_1 = arith.constant 0 : i32
    return %c0_i32, %c0_i32_0 : i32, i32
  }
  func.func @transform_5(%arg0: i32) -> (i32, i32) {
    %c0_i32 = arith.constant 0 : i32
    %c0_i32_0 = arith.constant 0 : i32
    return %arg0, %c0_i32 : i32, i32
  }
}

</mosaic_0001>

<bundles_post_ra>
// kernel: tpu_custom_call.1
= control target key start
LH: loop header
LB: loop body
LE: loop exit
PB: predicated region body
PF: predicated region fallthrough
CT: control target
= control target key end

     0   :  { %10 = vsyncpa [#allocation3], 0  ;;  %s929_s0 = inlined_call_operand.hbm [shape: f32[32,32], index: 0, kind: input, shape index: {}]   ;;  %s930_s1 = inlined_call_operand.vmem [shape: f32[1,32], index: 1, kind: input, shape index: {}]   ;;  %s931_s2 = inlined_call_operand.vmem [shape: f32[1,32], index: 2, kind: input, shape index: {}]   ;;  %s932_s3 = inlined_call_operand.hbm [shape: bf16[32,128], index: 3, kind: input, shape index: {}]   ;;  %s933_s4 = inlined_call_operand.vmem [shape: f32[1,128], index: 4, kind: input, shape index: {}]   ;;  %s934_s5 = inlined_call_operand.hbm [shape: f32[32,128], index: 5, kind: output, shape index: {}]  }
   0x1   :  { %12 = vsyncpa [#allocation3 + $0x1], 0 }
   0x2   :  { %13 = vsyncpa [#allocation6], 0 }
   0x3   :  { %14 = vsyncpa [#allocation4], 0 }
   0x4   :  { %16 = vsyncpa [#allocation4 + $0x1], 0  ;;  %s726_s18 = smov 0   ;;  %s728_s19 = smov 0  }
   0x5   :  { %s730_s20 = smov 0   ;;  %s732_s21 = smov 0  }
   0x6 LB: > { %s747_s22 = sadd.s32 4294967295, %s687_s21   ;;  %s459_s23 = sadd.s32 4294967294, %s687_s21   ;;  %s687_s21 = sphi %s732_s21, %s953_s21   ;;  %s683_s20 = sphi %s730_s20, %s952_s20   ;;  %s679_s19 = sphi %s728_s19, %s951_s19   ;;  %s675_s18 = sphi %s726_s18, %s950_s18  }
   0x7   : > { %p42_p0 = scmp.ne.s32.totalorder %s679_s19, %s675_s18  ;;  %p935_p1 = scmp.eq.s32.totalorder %s747_s22, 0 }
   0x8   : > { %p156_p3 = scmp.eq.s32.totalorder %s459_s23, 3  ;;  %p460_p5 = scmp.ge.s32.totalorder %s687_s21, 1 }
   0x9   : > { %p756_p4 = por %p935_p1, %p42_p0  ;;  %p163_p7 = scmp.lt.s32.totalorder %s687_s21, 5 }
   0xa   : > { %p761_p6 = por %p156_p3, %p42_p0  ;;  %s689_s27 = smov [#allocation5]  }
   0xb   : > { %s938_s24 = scalar_select %p756_p4, 1, 0 }
   0xc   : > { %s939_s25 = scalar_select %p761_p6, 1, 0 }
   0xd   : > { %p766_p8 = pnand %p460_p5, %p163_p7  ;;  %s181_s28 = sshll.u32 %s689_s27, 4  ;;  %s182_s28 = int_to_ptr.vmem [resolvable:$true] %s181_s28 }
   0xe   : > { %s779_s30 = sadd.s32 1, %s687_s21   ;;  %s29_s6 = sadd.s32 1, %s683_s20 }
   0xf   : > { %s940_s26 = scalar_select %p766_p8, 1, 0 }
  0x10   : > { %p498_p9 = pneg %p766_p8  ;;  %s26_s7 = ssub.s32 %s687_s21, %s779_s30 }
  0x11   : > { %s559_s10 = scalar_lea.hbm %s932_s3, 256 }
  0x12   : > { %p774_p10 = pnand %p498_p9, %p935_p1  ;;  %p560_p11 = scmp.ne.s32.totalorder %s932_s3, %s559_s10 }
  0x13   : > { %p566_p3 = scmp.lt.u32.totalorder %s559_s10, %s932_s3 }
  0x14   : > { %p561_p12 = pneg %p774_p10 }
  0x16   : > { %p562_p13 = pnand %p561_p12, %p560_p11 }
  0x18   : > { %p563_p0 = pneg %p562_p13 }
  0x1a   : > { %p568_p5 = pnand %p566_p3, %p563_p0 }
  0x1c   : > { %571 = shalt.err (!%p568_p5)
}
  0x1d   : > { %s572_s15 = scalar_lea.vmem %s182_s28, 256  ;;  %p580_p2 = scmp.lt.s32.totalorder %s182_s28, %s182_s28 }
  0x1e   : > { %p573_p7 = scmp.ne.s32.totalorder %s182_s28, %s572_s15  ;;  %p581_p6 = scmp.lt.s32.totalorder %s572_s15, %s572_s15 }
  0x20   : > { %p575_p9 = pnand %p573_p7, %p561_p12  ;;  %p582_p4 = por %p581_p6, %p580_p2 }
  0x22   : > { %p576_p1 = pneg %p575_p9 }
  0x24   : > { %p583_p8 = pnand %p582_p4, %p576_p1 }
  0x26   : > { %586 = shalt.err (!%p583_p8)
}
  0x27   : > { %s690_s16 = smov 64   ;;  %s691_s17 = smov 4  }
  0x28   : > { %501 = dma.hbm_to_vmem [thread:$0]  (!%p774_p10), %s932_s3, 256, %s182_s28, [#allocation6], %s690_s16, %s690_s16, %s691_s17  }
  0x29   : > { %p27_p11 = scmp.eq.s32.totalorder %s26_s7, 0  ;;  %p36_p2 = scmp.ne.s32.totalorder %s683_s20, %s679_s19 }
  0x2a   : > { %p37_p1 = scmp.eq.s32.totalorder %s687_s21, 0  ;;  %p511_p4 = scmp.lt.s32.totalorder %s687_s21, 4 }
  0x2b   : > { %s805_s8 = scalar_select %p27_p11, %s683_s20, %s29_s6  }
  0x2c   : > { %p38_p6 = por %p37_p1, %p36_p2  ;;  %p942_p8 = scmp.eq.s32.totalorder %s747_s22, 3 }
  0x2d   : > { %s198_s10 = sand.u32 1, %s683_s20   ;;  %s464_s11 = sshll.u32 %s687_s21, 7 }
  0x2e   : > { %p809_p12 = por %p942_p8, %p36_p2  ;;  %s463_s12 = sshll.u32 %s198_s10, 3 }
  0x2f   : > { %s818_s14 = scalar_lea.hbm %s929_s0, %s464_s11  ;;  %s202_s28 = scalar_lea.vmem [#allocation2], %s463_s12 }
  0x30   : > { %s209_s6 = sshll.u32 %s202_s28, 4  ;;  %p820_p10 = pnand %p511_p4, %p38_p6  ;;  %s824_s6 = int_to_ptr.vmem [resolvable:$true] %s209_s6 }
  0x31   : > { %s199_s15 = scalar_lea.sflag [#allocation3], %s198_s10  ;;  %s587_s16 = scalar_lea.hbm %s818_s14, 128 }
  0x32   : > { %p588_p13 = scmp.ne.s32.totalorder %s818_s14, %s587_s16  ;;  %p589_p0 = pneg %p820_p10 }
  0x33   : > { %s592_s27 = scalar_lea.hbm %s929_s0, 512  ;;  %p593_p7 = scmp.lt.u32.totalorder %s818_s14, %s929_s0 }
  0x34   : > { %p590_p3 = pnand %p589_p0, %p588_p13  ;;  %p594_p9 = scmp.lt.u32.totalorder %s592_s27, %s587_s16 }
  0x35   : > { %p596_p2 = scmp.lt.u32.totalorder %s587_s16, %s818_s14 }
  0x36   : > { %p591_p5 = pneg %p590_p3  ;;  %p595_p11 = por %p594_p9, %p593_p7 }
  0x38   : > { %p597_p1 = por %p596_p2, %p595_p11 }
  0x3a   : > { %p598_p4 = pnand %p597_p1, %p591_p5 }
  0x3c   : > { %601 = shalt.err (!%p598_p4)
}
  0x3d   : > { %s602_s10 = scalar_lea.vmem %s824_s6, 128  ;;  %s692_s29 = smov [#allocation2]  }
  0x3e   : > { %p603_p6 = scmp.ne.s32.totalorder %s824_s6, %s602_s10  ;;  %s607_s13 = sshll.u32 %s692_s29, 4  ;;  %s608_s13 = int_to_ptr.vmem [resolvable:$false] %s607_s13 }
  0x3f   : > { %s609_s28 = scalar_lea.vmem %s608_s13, 256  ;;  %p610_p3 = scmp.lt.s32.totalorder %s824_s6, %s608_s13 }
  0x40   : > { %p605_p8 = pnand %p603_p6, %p589_p0  ;;  %p611_p7 = scmp.lt.s32.totalorder %s609_s28, %s602_s10 }
  0x42   : > { %p606_p13 = pneg %p605_p8  ;;  %p612_p9 = por %p611_p7, %p610_p3 }
  0x44   : > { %p613_p11 = pnand %p612_p9, %p606_p13 }
  0x46   : > { %616 = shalt.err (!%p613_p11)
}
  0x47   : > { %505 = dma.hbm_to_vmem [thread:$0]  (!%p820_p10), %s818_s14, 128, %s824_s6, %s199_s15  }
  0x48   : > { %p945_p5 = scmp.ne.s32.totalorder %s940_s26, 0 }
  0x49   : > { %s854_s16 = sand.u32 (!%p945_p5), 1, %s679_s19   ;;  %p946_p0 = scmp.ne.s32.totalorder (!%p945_p5), %s938_s24, 0 }
  0x4a   : > { %218 = sbr.rel (%p945_p5) target bundleno = 943 (0x3af), region = 40  ;;  %s466_s17 = sshll.u32 (!%p945_p5), %s854_s16, 3 }
  0x4b   : > { %s221_s23 = scalar_lea.sflag (!%p945_p5), [#allocation3], %s854_s16  ;;  %s224_s27 = scalar_lea.vmem (!%p945_p5), [#allocation2], %s466_s17 }
  0x51   : > { %662 = dma.done.wait (%p946_p0), %s221_s23, 128  }
  0x52   : > { %664 = vsyncadd (%p946_p0), %s221_s23, 4294967168  ;;  %p947_p10 = scmp.eq.s32.totalorder %s747_s22, 0 }
  0x54   : > { %666 = dma.done.wait (%p947_p10), [#allocation6], 256   ;;  %p948_p2 = pmov %p947_p10 }
  0x55   : > { %vm257_vm0 = vcmask 261120   ;;  %v256_v0 = vld [vmem:[%s224_s27] sm:$0xff]  ;;  %v551_v7 = vld [vmem:[#allocation5] sm:$0xff]   ;;  %v693_v8 = vmov 0.0   ;;  %v552_v9 = vld [vmem:[#allocation5 + $0x8] sm:$0xff]   ;;  %vm694_vm1 = vmmov 0  }
  0x56   : > { %668 = vsyncadd (%p948_p2), [#allocation6], 4294967040  ;;  %v258_v1 = vsel %vm257_vm0, %v256_v0, 0.0  ;;  %482 = vmatprep.subr.bf16.mxu0 %v693_v8  ;;  %486 = vmatprep.mubr.msk.bf16.mxu0 %vm694_vm1, %v693_v8  ;;  %v469_v14 = vld [vmem:[%s930_s1] ss:$0 sm:$0xff]  ;;  %s476_s11 = sshll.u32 %s747_s22, 7 }
  0x57   : > { %259 = vadd.xlane.f32.xlu0 %v258_v1  ;;  %483 = vmatpush3.bf16.msra.mxu0 %v551_v7  ;;  %v470_v16 = vld [vmem:[%s931_s2] ss:$0 sm:$0xff]  ;;  %s254_s12 = scalar_lea.vmem [#allocation7], %s466_s17  ;;  %s886_s28 = scalar_lea.hbm %s934_s5, %s476_s11 }
  0x58   : > { %484 = vmatprep.subr.bf16.mxu0 %v693_v8  ;;  %v471_v20 = vld [vmem:[%s933_s4] ss:$0 sm:$0xff]  ;;  %s379_s10 = sshll.u32 %s254_s12, 4  ;;  %s366_s23 = scalar_lea.sflag [#allocation4], %s854_s16  ;;  %s888_s10 = int_to_ptr.vmem [resolvable:$true] %s379_s10 }
  0x59   : > { %s617_s27 = scalar_lea.vmem %s888_s10, 128  ;;  %s695_s22 = smov [#allocation7]  }
  0x5a   : > { %p618_p1 = scmp.ne.s32.totalorder %s888_s10, %s617_s27  ;;  %s621_s17 = sshll.u32 %s695_s22, 4  ;;  %s622_s17 = int_to_ptr.vmem [resolvable:$false] %s621_s17 }
  0x5b   : > { %485 = vmatpush3.bf16.msra.mxu0 %v552_v9  ;;  %s623_s24 = scalar_lea.vmem %s622_s17, 256  ;;  %p624_p8 = scmp.lt.s32.totalorder %s888_s10, %s622_s17 }
  0x5c   : > { %p619_p4 = pnand %p618_p1, %p809_p12  ;;  %p625_p13 = scmp.lt.s32.totalorder %s623_s24, %s617_s27 }
  0x5e   : > { %p620_p6 = pneg %p619_p4  ;;  %p626_p3 = por %p625_p13, %p624_p8 }
  0x60   : > { %p627_p7 = pnand %p626_p3, %p620_p6 }
  0xe4   : > { %v260_v2 = vpop.xlane.xlu0 %259 }
  0xe5   : > { %v261_v3 = vmul.f32 0.03125, %v260_v2 }
  0xe7   : > { %v262_v4 = vsub.f32 %v256_v0, %v261_v3 }
  0xe9   : > { %v263_v5 = vmul.f32 %v262_v4, %v262_v4 }
  0xeb   : > { %v264_v6 = vsel %vm257_vm0, %v263_v5, 0.0 }
  0xec   : > { %265 = vadd.xlane.f32.xlu0 %v264_v6 }
 0x179   : > { %v266_v10 = vpop.xlane.xlu0 %265 }
 0x17a   : > { %v267_v11 = vmul.f32 0.03125, %v266_v10 }
 0x17c   : > { %v268_v12 = vadd.f32 1e-05, %v267_v11 }
 0x17e   : > { %553 = vrsqrt.f32 %v268_v12 }
 0x188   : > { %v554_v13 = vpop.eup %553 }
 0x189   : > { %v270_v15 = vmul.f32 %v554_v13, %v262_v4 }
 0x18b   : > { %v278_v17 = vmul.f32 %v469_v14, %v270_v15 }
 0x18d   : > { %v286_v18 = vadd.f32 %v470_v16, %v278_v17 }
 0x18f   : > { %v287_v19 = vpack.c.bf16 %v286_v18, %v286_v18 }
 0x191   : > { %487 = vmatmul.mubr.msk.bf16.vlgmr.msra.gmra.mrb[0].mxu0 %vm257_vm0, %v287_v19 }
 0x264   : > { %v348_v21 = vpop.f32.mrb[0].mxu0 }
 0x265   : > { %v349_v22 = vadd.f32 %v471_v20, %v348_v21  ;;  %v488_v23 = vpop.f32.mrb[1].mxu0 }
 0x266   : > { %v351_v24 = vpop.f32.mrb[2].mxu0 }
 0x267   : > { %354 = vmax.xlane.f32.xlu1 %v349_v22  ;;  %v489_v25 = vpop.f32.mrb[3].mxu0 }
 0x2f4   : > { %v355_v26 = vpop.xlane.xlu1 %354 }
 0x2f5   : > { %v356_v27 = vsub.f32 %v349_v22, %v355_v26 }
 0x2f7   : > { %v357_v28 = vmul.f32 1.442695, %v356_v27 }
 0x2f9   : > { %555 = vpow2.f32 %v357_v28 }
 0x303   : > { %v556_v29 = vpop.eup %555 }
 0x304   : > { %359 = vadd.xlane.f32.xlu1 %v556_v29 }
 0x391   : > { %v360_v30 = vpop.xlane.xlu1 %359 }
 0x392   : > { %557 = vlog2.f32 %v360_v30 }
 0x39c   : > { %v558_v31 = vpop.eup %557 }
 0x39d   : > { %v362_v32 = vmul.f32 0.6931472, %v558_v31 }
 0x39f   : > { %v363_v33 = vsub.f32 %v356_v27, %v362_v32 }
 0x3a1   : > { %364 = vst [vmem:[%s254_s12] sm:$0xff] %v363_v33 }
 0x3a2   : > { %630 = shalt.err (!%p627_p7)
}
 0x3a3   : > { %s631_s16 = scalar_lea.hbm %s886_s28, 128  ;;  %s635_s6 = scalar_lea.hbm %s934_s5, 512 }
 0x3a4   : > { %p632_p9 = scmp.ne.s32.totalorder %s886_s28, %s631_s16  ;;  %p636_p0 = scmp.lt.u32.totalorder %s886_s28, %s934_s5 }
 0x3a5   : > { %p637_p10 = scmp.lt.u32.totalorder %s635_s6, %s631_s16  ;;  %p639_p1 = scmp.lt.u32.totalorder %s631_s16, %s886_s28 }
 0x3a6   : > { %p633_p11 = pnand %p632_p9, %p809_p12 }
 0x3a7   : > { %p638_p2 = por %p637_p10, %p636_p0 }
 0x3a8   : > { %p634_p5 = pneg %p633_p11 }
 0x3a9   : > { %p640_p4 = por %p639_p1, %p638_p2 }
 0x3ab   : > { %p641_p6 = pnand %p640_p4, %p634_p5 }
 0x3ad   : > { %644 = shalt.err (!%p641_p6)
}
 0x3ae   : > { %496 = dma.vmem_to_hbm [thread:$0]  (%p809_p12), %s888_s10, 128, %s886_s28, %s366_s23  }
 0x3af PF: > { %p513_p8 = scmp.ge.s32.totalorder %s687_s21, 2  ;;  %s391_s11 = sand.u32 1, %s675_s18  }
 0x3b0   : > { %p949_p13 = scmp.ne.s32.totalorder %s939_s25, 0  ;;  %s392_s12 = scalar_lea.sflag [#allocation4], %s391_s11 }
 0x3b2   : > { %p507_p3 = pnand %p513_p8, %p949_p13 }
 0x3b4   : > { %670 = dma.done.wait (!%p507_p3), %s392_s12, 128  }
 0x3b5   : > { %672 = vsyncadd (!%p507_p3), %s392_s12, 4294967168  ;;  %p19_p7 = scmp.ge.s32.totalorder %s779_s30, 6   ;;  %s950_s18 = smov %s679_s19 }
 0x3b6   : > { %s951_s19 = smov %s683_s20  ;;  %s952_s20 = smov %s805_s8 }
 0x3b7   : > { %s953_s21 = smov %s779_s30  ;;  %21 = sbr.rel (!%p19_p7) target bundleno = 6 (0x6), region = 89 }
 0x3be   :  { %397 = vsyncpa [#allocation3], 1 }
 0x3bf   :  { %399 = vsyncpa [#allocation3 + $0x1], 1 }
 0x3c0   :  { %400 = vsyncpa [#allocation6], 1 }
 0x3c1   :  { %401 = vsyncpa [#allocation4], 1 }
 0x3c2   :  { %403 = vsyncpa [#allocation4 + $0x1], 1 }

</bundles_post_ra>
